<compile_context>
chip_gen: v7x
topology: tpu7x:2x2x1
jax: 0.10.0
libtpu: 0.0.40
codegen_flags: <defaults>
</compile_context>

<pallas_src>
import functools

import jax
import jax.numpy as jnp
from jax.experimental import pallas as pl
from jax.experimental.pallas import tpu as pltpu


def _ffn_kernel(x_ref, w1_ref, b1_ref, w2_ref, b2_ref, gamma_ref, beta_ref,
                o_ref, acc_ref, *, d_model, eps):
    f = pl.program_id(1)

    @pl.when(f == 0)
    def _init():
        acc_ref[...] = jnp.zeros_like(acc_ref)

    # Fused FFN chunk: relu(x @ W1[:, f_blk] + b1[f_blk]) @ W2[f_blk, :],
    # accumulated in f32.
    x = x_ref[...]                                            # native dtype
    h = jnp.dot(x, w1_ref[...], preferred_element_type=jnp.float32)
    h = jnp.maximum(h + b1_ref[...].astype(jnp.float32), 0.0)
    acc_ref[...] += jnp.dot(h.astype(w2_ref.dtype), w2_ref[...],
                            preferred_element_type=jnp.float32)

    @pl.when(f == pl.num_programs(1) - 1)
    def _finalize():
        # Residual + bias2 (padded lanes remain exactly 0).
        t = (x.astype(jnp.float32) + acc_ref[...]
             + b2_ref[...].astype(jnp.float32))
        # One-pass LayerNorm over the real d_model lanes.
        inv_d = 1.0 / d_model
        s = jnp.sum(t, axis=-1, keepdims=True)
        ss = jnp.sum(t * t, axis=-1, keepdims=True)
        mean = s * inv_d
        var = jnp.maximum(ss * inv_d - mean * mean, 0.0)
        normed = (t - mean) * jax.lax.rsqrt(var + eps)
        out = (normed * gamma_ref[...].astype(jnp.float32)
               + beta_ref[...].astype(jnp.float32))
        o_ref[...] = out.astype(o_ref.dtype)


def _round_up(v, m):
    return (v + m - 1) // m * m


def _pad_to(a, shape):
    pads = [(0, t - s) for s, t in zip(a.shape, shape)]
    if all(p == (0, 0) for p in pads):
        return a
    return jnp.pad(a, pads)


def ffn_layer(tgt, w1, b1, w2, b2, gamma, beta, *, eps=1e-5,
              tile_n_max=256, tile_f_max=512):
    """tgt: (..., d_model); w1: (d_model, dim_ff), b1: (dim_ff,),
       w2: (dim_ff, d_model), b2/gamma/beta: (d_model,)."""
    orig_shape = tgt.shape
    d_model = orig_shape[-1]
    dim_ff = w1.shape[1]
    x2d = tgt.reshape(-1, d_model)
    n = x2d.shape[0]

    # Lane-dense feature dims (multiples of 128), sublane-aligned token tile.
    d_pad = _round_up(d_model, 128)
    f_pad = _round_up(dim_ff, 128)
    tile_f = min(_round_up(tile_f_max, 128), f_pad)
    f_pad = _round_up(f_pad, tile_f)
    tile_n = min(_round_up(tile_n_max, 8), _round_up(n, 8))
    n_pad = _round_up(n, tile_n)

    x_p = _pad_to(x2d, (n_pad, d_pad))
    w1_p = _pad_to(w1, (d_pad, f_pad))
    b1_p = _pad_to(b1.reshape(1, dim_ff), (1, f_pad))
    w2_p = _pad_to(w2, (f_pad, d_pad))
    b2_p = _pad_to(b2.reshape(1, d_model), (1, d_pad))
    g_p = _pad_to(gamma.reshape(1, d_model), (1, d_pad))
    be_p = _pad_to(beta.reshape(1, d_model), (1, d_pad))

    grid = (n_pad // tile_n, f_pad // tile_f)
    kernel = functools.partial(_ffn_kernel, d_model=d_model, eps=eps)

    itemsize = jnp.dtype(tgt.dtype).itemsize
    cost = pl.CostEstimate(
        flops=4 * n * d_model * dim_ff,
        transcendentals=n,
        bytes_accessed=(2 * n * d_model + 2 * d_model * dim_ff
                        + dim_ff + 3 * d_model) * itemsize,
    )

    out = pl.pallas_call(
        kernel,
        out_shape=jax.ShapeDtypeStruct((n_pad, d_pad), tgt.dtype),
        grid_spec=pltpu.PrefetchScalarGridSpec(
            num_scalar_prefetch=0,
            grid=grid,
            in_specs=[
                pl.BlockSpec((tile_n, d_pad), lambda i, f: (i, 0)),   # x
                pl.BlockSpec((d_pad, tile_f), lambda i, f: (0, f)),   # w1
                pl.BlockSpec((1, tile_f), lambda i, f: (0, f)),       # b1
                pl.BlockSpec((tile_f, d_pad), lambda i, f: (f, 0)),   # w2
                pl.BlockSpec((1, d_pad), lambda i, f: (0, 0)),        # b2
                pl.BlockSpec((1, d_pad), lambda i, f: (0, 0)),        # gamma
                pl.BlockSpec((1, d_pad), lambda i, f: (0, 0)),        # beta
            ],
            out_specs=pl.BlockSpec((tile_n, d_pad), lambda i, f: (i, 0)),
            scratch_shapes=[pltpu.VMEM((tile_n, d_pad), jnp.float32)],
        ),
        compiler_params=pltpu.CompilerParams(
            dimension_semantics=("parallel", "arbitrary"),
            vmem_limit_bytes=64 * 1024 * 1024,
        ),
        cost_estimate=cost,
    )(x_p, w1_p, b1_p, w2_p, b2_p, g_p, be_p)

    return out[:n, :d_model].reshape(orig_shape)


def xavier_uniform(key, fan_in, fan_out, shape, dtype=jnp.float32):
    bound = (6.0 / (fan_in + fan_out)) ** 0.5
    return jax.random.uniform(key, shape, dtype, minval=-bound, maxval=bound)


if __name__ == "__main__":
    # Small shapes consistent with a transformer FFN layer: tgt (seq, batch, d_model).
    seq, batch, d_model, dim_ff = 8, 2, 32, 256

    key = jax.random.PRNGKey(0)
    k_x, k_w1, k_b1, k_w2, k_b2 = jax.random.split(key, 5)

    tgt = jax.random.normal(k_x, (seq, batch, d_model), jnp.float32)

    # xavier_uniform on weights (as in _reset_parameters); default Linear bias init.
    w1 = xavier_uniform(k_w1, d_model, dim_ff, (d_model, dim_ff))
    b1 = jax.random.uniform(k_b1, (dim_ff,), jnp.float32,
                            minval=-1.0 / d_model ** 0.5,
                            maxval=1.0 / d_model ** 0.5)
    w2 = xavier_uniform(k_w2, dim_ff, d_model, (dim_ff, d_model))
    b2 = jax.random.uniform(k_b2, (d_model,), jnp.float32,
                            minval=-1.0 / dim_ff ** 0.5,
                            maxval=1.0 / dim_ff ** 0.5)
    gamma = jnp.ones((d_model,), jnp.float32)   # LayerNorm default weight
    beta = jnp.zeros((d_model,), jnp.float32)   # LayerNorm default bias

    # Small tiles so the demo exercises both grid axes (2 token tiles x 2 ff tiles).
    out = ffn_layer(tgt, w1, b1, w2, b2, gamma, beta,
                    tile_n_max=8, tile_f_max=128)
    jax.block_until_ready(out)

    # Pure-JAX reference of the same math (dropout p=0.0 -> identity).
    x2d = tgt.reshape(-1, d_model)
    ref = x2d + (jnp.maximum(x2d @ w1 + b1, 0.0) @ w2 + b2)
    mean = ref.mean(-1, keepdims=True)
    var = ((ref - mean) ** 2).mean(-1, keepdims=True)
    ref = ((ref - mean) / jnp.sqrt(var + 1e-5)) * gamma + beta
    ref = ref.reshape(seq, batch, d_model)
    assert jnp.allclose(out, ref, atol=1e-4, rtol=1e-4), float(
        jnp.max(jnp.abs(out - ref)))

    print("KERNEL_OK")
</pallas_src>

<mosaic_0001>
module attributes {stable_mosaic.version = 11 : i64} {
  func.func @_ffn_kernel(%arg0: i32, %arg1: i32, %arg2: memref<8x128xf32, #tpu.memory_space<vmem>>, %arg3: memref<128x128xf32, #tpu.memory_space<vmem>>, %arg4: memref<1x128xf32, #tpu.memory_space<vmem>>, %arg5: memref<128x128xf32, #tpu.memory_space<vmem>>, %arg6: memref<1x128xf32, #tpu.memory_space<vmem>>, %arg7: memref<1x128xf32, #tpu.memory_space<vmem>>, %arg8: memref<1x128xf32, #tpu.memory_space<vmem>>, %arg9: memref<8x128xf32, #tpu.memory_space<vmem>>, %arg10: memref<8x128xf32, #tpu.memory_space<vmem>>) attributes {dimension_semantics = [#tpu.dimension_semantics<parallel>, #tpu.dimension_semantics<arbitrary>], iteration_bounds = array<i64: 2, 2>, scalar_prefetch = 0 : i64, scratch_operands = 1 : i64, tpu.core_type = #tpu.core_type<tc>, window_params = [{transform_indices = @transform_0, window_bounds = array<i64: 8, 128>}, {transform_indices = @transform_1, window_bounds = array<i64: 128, 128>}, {transform_indices = @transform_2, window_bounds = array<i64: 1, 128>}, {transform_indices = @transform_3, window_bounds = array<i64: 128, 128>}, {pipeline_mode = #tpu.pipeline_mode<synchronous>, transform_indices = @transform_4, window_bounds = array<i64: 1, 128>}, {pipeline_mode = #tpu.pipeline_mode<synchronous>, transform_indices = @transform_5, window_bounds = array<i64: 1, 128>}, {pipeline_mode = #tpu.pipeline_mode<synchronous>, transform_indices = @transform_6, window_bounds = array<i64: 1, 128>}, {transform_indices = @transform_7, window_bounds = array<i64: 8, 128>}]} {
    %c0_i32 = arith.constant 0 : i32
    %0 = arith.cmpi eq, %arg1, %c0_i32 : i32
    %1 = arith.extui %0 : i1 to i32
    %c0_i32_0 = arith.constant 0 : i32
    %2 = arith.cmpi ne, %1, %c0_i32_0 : i32
    scf.if %2 {
      %cst_15 = arith.constant 0.000000e+00 : f32
      %19 = vector.broadcast %cst_15 : f32 to vector<8x128xf32>
      %c0_16 = arith.constant 0 : index
      %c0_17 = arith.constant 0 : index
      %20 = vector.load %arg10[%c0_16, %c0_17] : memref<8x128xf32, #tpu.memory_space<vmem>>, vector<8x128xf32>
      tpu.vector_store %arg10[%c0_16, %c0_17], %19 {strides = array<i32>} : memref<8x128xf32, #tpu.memory_space<vmem>>, vector<8x128xf32>,
    } else {
    }
    %c0 = arith.constant 0 : index
    %c0_1 = arith.constant 0 : index
    %3 = vector.load %arg2[%c0, %c0_1] : memref<8x128xf32, #tpu.memory_space<vmem>>, vector<8x128xf32>
    %c0_2 = arith.constant 0 : index
    %c0_3 = arith.constant 0 : index
    %4 = vector.load %arg3[%c0_2, %c0_3] : memref<128x128xf32, #tpu.memory_space<vmem>>, vector<128x128xf32>
    %cst = arith.constant dense<0.000000e+00> : vector<8x128xf32>
    %5 = tpu.matmul %3, %4, %cst {dimension_numbers = #tpu.dot_dimension_numbers<[1], [0], [0], [1], [0, 0, 1, 1], [], []>} : vector<8x128xf32>, vector<128x128xf32>, vector<8x128xf32> -> vector<8x128xf32>
    %c0_4 = arith.constant 0 : index
    %c0_5 = arith.constant 0 : index
    %6 = vector.load %arg4[%c0_4, %c0_5] : memref<1x128xf32, #tpu.memory_space<vmem>>, vector<1x128xf32>
    %7 = vector.broadcast %6 : vector<1x128xf32> to vector<8x128xf32>
    %8 = arith.addf %5, %7 : vector<8x128xf32>
    %cst_6 = arith.constant 0.000000e+00 : f32
    %9 = vector.broadcast %cst_6 : f32 to vector<8x128xf32>
    %10 = arith.maximumf %8, %9 : vector<8x128xf32>
    %c0_7 = arith.constant 0 : index
    %c0_8 = arith.constant 0 : index
    %11 = vector.load %arg10[%c0_7, %c0_8] : memref<8x128xf32, #tpu.memory_space<vmem>>, vector<8x128xf32>
    %c0_9 = arith.constant 0 : index
    %c0_10 = arith.constant 0 : index
    %12 = vector.load %arg5[%c0_9, %c0_10] : memref<128x128xf32, #tpu.memory_space<vmem>>, vector<128x128xf32>
    %cst_11 = arith.constant dense<0.000000e+00> : vector<8x128xf32>
    %13 = tpu.matmul %10, %12, %cst_11 {dimension_numbers = #tpu.dot_dimension_numbers<[1], [0], [0], [1], [0, 0, 1, 1], [], []>} : vector<8x128xf32>, vector<128x128xf32>, vector<8x128xf32> -> vector<8x128xf32>
    %14 = arith.addf %11, %13 : vector<8x128xf32>
    %c0_12 = arith.constant 0 : index
    %c0_13 = arith.constant 0 : index
    %15 = vector.load %arg10[%c0_12, %c0_13] : memref<8x128xf32, #tpu.memory_space<vmem>>, vector<8x128xf32>
    tpu.vector_store %arg10[%c0_12, %c0_13], %14 {strides = array<i32>} : memref<8x128xf32, #tpu.memory_space<vmem>>, vector<8x128xf32>,
    %c1_i32 = arith.constant 1 : i32
    %16 = arith.cmpi eq, %arg1, %c1_i32 : i32
    %17 = arith.extui %16 : i1 to i32
    %c0_i32_14 = arith.constant 0 : i32
    %18 = arith.cmpi ne, %17, %c0_i32_14 : i32
    scf.if %18 {
      %c0_15 = arith.constant 0 : index
      %c0_16 = arith.constant 0 : index
      %19 = vector.load %arg10[%c0_15, %c0_16] : memref<8x128xf32, #tpu.memory_space<vmem>>, vector<8x128xf32>
      %20 = arith.addf %3, %19 : vector<8x128xf32>
      %c0_17 = arith.constant 0 : index
      %c0_18 = arith.constant 0 : index
      %21 = vector.load %arg6[%c0_17, %c0_18] : memref<1x128xf32, #tpu.memory_space<vmem>>, vector<1x128xf32>
      %22 = vector.broadcast %21 : vector<1x128xf32> to vector<8x128xf32>
      %23 = arith.addf %20, %22 : vector<8x128xf32>
      %cst_19 = arith.constant dense<0.000000e+00> : vector<8xf32>
      %24 = vector.multi_reduction <add>, %23, %cst_19 [1] : vector<8x128xf32> to vector<8xf32>
      %25 = vector.shape_cast %24 : vector<8xf32> to vector<8x1xf32>
      %26 = arith.mulf %23, %23 : vector<8x128xf32>
      %cst_20 = arith.constant dense<0.000000e+00> : vector<8xf32>
      %27 = vector.multi_reduction <add>, %26, %cst_20 [1] : vector<8x128xf32> to vector<8xf32>
      %28 = vector.shape_cast %27 : vector<8xf32> to vector<8x1xf32>
      %cst_21 = arith.constant 3.125000e-02 : f32
      %29 = vector.broadcast %cst_21 : f32 to vector<8x1xf32>
      %30 = arith.mulf %25, %29 : vector<8x1xf32>
      %cst_22 = arith.constant 3.125000e-02 : f32
      %31 = vector.broadcast %cst_22 : f32 to vector<8x1xf32>
      %32 = arith.mulf %28, %31 : vector<8x1xf32>
      %33 = arith.mulf %30, %30 : vector<8x1xf32>
      %34 = arith.subf %32, %33 : vector<8x1xf32>
      %cst_23 = arith.constant 0.000000e+00 : f32
      %35 = vector.broadcast %cst_23 : f32 to vector<8x1xf32>
      %36 = arith.maximumf %34, %35 : vector<8x1xf32>
      %37 = vector.broadcast %30 : vector<8x1xf32> to vector<8x128xf32>
      %38 = arith.subf %23, %37 : vector<8x128xf32>
      %cst_24 = arith.constant 9.99999974E-6 : f32
      %39 = vector.broadcast %cst_24 : f32 to vector<8x1xf32>
      %40 = arith.addf %36, %39 : vector<8x1xf32>
      %41 = math.rsqrt %40 : vector<8x1xf32>
      %42 = vector.broadcast %41 : vector<8x1xf32> to vector<8x128xf32>
      %43 = arith.mulf %38, %42 : vector<8x128xf32>
      %c0_25 = arith.constant 0 : index
      %c0_26 = arith.constant 0 : index
      %44 = vector.load %arg7[%c0_25, %c0_26] : memref<1x128xf32, #tpu.memory_space<vmem>>, vector<1x128xf32>
      %45 = vector.broadcast %44 : vector<1x128xf32> to vector<8x128xf32>
      %46 = arith.mulf %43, %45 : vector<8x128xf32>
      %c0_27 = arith.constant 0 : index
      %c0_28 = arith.constant 0 : index
      %47 = vector.load %arg8[%c0_27, %c0_28] : memref<1x128xf32, #tpu.memory_space<vmem>>, vector<1x128xf32>
      %48 = vector.broadcast %47 : vector<1x128xf32> to vector<8x128xf32>
      %49 = arith.addf %46, %48 : vector<8x128xf32>
      %c0_29 = arith.constant 0 : index
      %c0_30 = arith.constant 0 : index
      %50 = vector.load %arg9[%c0_29, %c0_30] : memref<8x128xf32, #tpu.memory_space<vmem>>, vector<8x128xf32>
      tpu.vector_store %arg9[%c0_29, %c0_30], %49 {strides = array<i32>} : memref<8x128xf32, #tpu.memory_space<vmem>>, vector<8x128xf32>,
    } else {
    }
    return
  }
  func.func @transform_0(%arg0: i32, %arg1: i32) -> (i32, i32) {
    %c0_i32 = arith.constant 0 : i32
    %c0_i32_0 = arith.constant 0 : i32
    return %arg0, %c0_i32 : i32, i32
  }
  func.func @transform_1(%arg0: i32, %arg1: i32) -> (i32, i32) {
    %c0_i32 = arith.constant 0 : i32
    %c0_i32_0 = arith.constant 0 : i32
    return %c0_i32, %arg1 : i32, i32
  }
  func.func @transform_2(%arg0: i32, %arg1: i32) -> (i32, i32) {
    %c0_i32 = arith.constant 0 : i32
    %c0_i32_0 = arith.constant 0 : i32
    return %c0_i32, %arg1 : i32, i32
  }
  func.func @transform_3(%arg0: i32, %arg1: i32) -> (i32, i32) {
    %c0_i32 = arith.constant 0 : i32
    %c0_i32_0 = arith.constant 0 : i32
    return %arg1, %c0_i32 : i32, i32
  }
  func.func @transform_4(%arg0: i32, %arg1: i32) -> (i32, i32) {
    %c0_i32 = arith.constant 0 : i32
    %c0_i32_0 = arith.constant 0 : i32
    %c0_i32_1 = arith.constant 0 : i32
    return %c0_i32, %c0_i32_0 : i32, i32
  }
  func.func @transform_5(%arg0: i32, %arg1: i32) -> (i32, i32) {
    %c0_i32 = arith.constant 0 : i32
    %c0_i32_0 = arith.constant 0 : i32
    %c0_i32_1 = arith.constant 0 : i32
    return %c0_i32, %c0_i32_0 : i32, i32
  }
  func.func @transform_6(%arg0: i32, %arg1: i32) -> (i32, i32) {
    %c0_i32 = arith.constant 0 : i32
    %c0_i32_0 = arith.constant 0 : i32
    %c0_i32_1 = arith.constant 0 : i32
    return %c0_i32, %c0_i32_0 : i32, i32
  }
  func.func @transform_7(%arg0: i32, %arg1: i32) -> (i32, i32) {
    %c0_i32 = arith.constant 0 : i32
    %c0_i32_0 = arith.constant 0 : i32
    return %arg0, %c0_i32 : i32, i32
  }
}

</mosaic_0001>

<bundles_post_ra>
// kernel: tpu_custom_call.1
= control target key start
LH: loop header
LB: loop body
LE: loop exit
PB: predicated region body
PF: predicated region fallthrough
CT: control target
= control target key end

     0   :  { %s2144_s0 = inlined_call_operand.hbm [shape: f32[16,128], index: 0, kind: input, shape index: {}]   ;;  %s2145_s1 = inlined_call_operand.hbm [shape: f32[128,256], index: 1, kind: input, shape index: {}]   ;;  %s2146_s2 = inlined_call_operand.hbm [shape: f32[1,256], index: 2, kind: input, shape index: {}]   ;;  %s2147_s3 = inlined_call_operand.hbm [shape: f32[256,128], index: 3, kind: input, shape index: {}]   ;;  %s2148_s4 = inlined_call_operand.hbm [shape: f32[1,128], index: 4, kind: input, shape index: {}]   ;;  %s2149_s5 = inlined_call_operand.hbm [shape: f32[1,128], index: 5, kind: input, shape index: {}]   ;;  %s2150_s6 = inlined_call_operand.hbm [shape: f32[1,128], index: 6, kind: input, shape index: {}]   ;;  %s2151_s7 = inlined_call_operand.hbm [shape: f32[16,128], index: 7, kind: output, shape index: {}]  }
   0x1   :  { %2176 = sst [smem:[#allocation29_spill]] %s2144_s0 }
   0x2   :  { %2177 = sst [smem:[#allocation30_spill]] %s2145_s1 }
   0x3   :  { %2178 = sst [smem:[#allocation31_spill]] %s2147_s3 }
   0x4   :  { %2179 = sst [smem:[#allocation32_spill]] %s2148_s4 }
   0x5   :  { %2180 = sst [smem:[#allocation33_spill]] %s2149_s5 }
   0x6   :  { %2181 = sst [smem:[#allocation34_spill]] %s2150_s6 }
   0x7   :  { %2182 = sst [smem:[#allocation35_spill]] %s2151_s7 }
   0x8   :  { %12 = vsyncpa [#allocation4], 0 }
   0x9   :  { %14 = vsyncpa [#allocation4 + $0x1], 0 }
   0xa   :  { %15 = vsyncpa [#allocation7], 0 }
   0xb   :  { %17 = vsyncpa [#allocation7 + $0x1], 0 }
   0xc   :  { %18 = vsyncpa [#allocation10], 0 }
   0xd   :  { %20 = vsyncpa [#allocation10 + $0x1], 0 }
   0xe   :  { %21 = vsyncpa [#allocation13], 0 }
   0xf   :  { %22 = vsyncpa [#allocation5], 0 }
  0x10   :  { %24 = vsyncpa [#allocation5 + $0x1], 0  ;;  %s1616_s24 = smov 0   ;;  %s1618_s25 = smov 0  }
  0x11   :  { %s1620_s26 = smov 0   ;;  %s1622_s27 = smov 0  }
  0x12   :  { %s1624_s28 = smov 0   ;;  %s1626_s29 = smov 0  }
  0x13   :  { %s1628_s30 = smov 0   ;;  %s1630_s8 = smov 0  }
  0x14   :  { %s1632_s9 = smov 0   ;;  %s1634_s10 = smov 0  }
  0x15   :  { %s1636_s11 = smov 0  }
  0x16 LB: > { %2183 = sst [smem:[#allocation22_spill]] %s1523_s25  ;;  %s1670_s12 = sadd.s32 4294967295, %s1559_s11   ;;  %s1559_s11 = sphi %s1636_s11, %s30_s11   ;;  %s1555_s10 = sphi %s1634_s10, %s2247_s10   ;;  %s1551_s9 = sphi %s1632_s9, %s2246_s9   ;;  %s1547_s8 = sphi %s1630_s8, %s2245_s8   ;;  %s1543_s30 = sphi %s1628_s30, %s2244_s30   ;;  %s1539_s29 = sphi %s1626_s29, %s2243_s29   ;;  %s1535_s28 = sphi %s1624_s28, %s2242_s28   ;;  %s1531_s27 = sphi %s1622_s27, %s2241_s27   ;;  %s1527_s26 = sphi %s1620_s26, %s2240_s26   ;;  %s1523_s25 = sphi %s1618_s25, %s2239_s25   ;;  %s1519_s24 = sphi %s1616_s24, %s2235_s24  }
  0x17   : > { %2184 = sst [smem:[#allocation23_spill]] %s1543_s30  ;;  %p88_p0 = scmp.ne.s32.totalorder %s1523_s25, %s1519_s24 }
  0x18   : > { %2185 = sst [smem:[#allocation24_spill]] %s1547_s8  ;;  %p2153_p1 = scmp.eq.s32.totalorder %s1670_s12, 0 }
  0x19   : > { %p876_p2 = scmp.ge.s32.totalorder %s1559_s11, 1  ;;  %p240_p3 = scmp.lt.s32.totalorder %s1559_s11, 5 }
  0x1a   : > { %p1678_p4 = por %p88_p0, %p2153_p1  ;;  %s1561_s15 = smov [#allocation11]  }
  0x1b   : > { %p1682_p5 = pnand %p876_p2, %p240_p3  ;;  %s253_s16 = sshll.u32 %s1561_s15, 4  ;;  %s254_s16 = int_to_ptr.vmem [resolvable:$true] %s253_s16 }
  0x1c   : > { %s2186_s13 = scalar_select %p1678_p4, 1, 0 }
  0x1d   : > { %s2188_s14 = scalar_select %p1682_p5, 1, 0 }
  0x1e   : > { %2187 = sst [smem:[#allocation25_spill]] %s2186_s13  ;;  %p1082_p6 = pneg %p1682_p5 }
  0x1f   : > { %2189 = sst [smem:[#allocation26_spill]] %s2188_s14  ;;  %s1562_s17 = smov [#allocation12]  }
  0x20   : > { %s264_s18 = sshll.u32 %s1562_s17, 4  ;;  %p1690_p7 = pnand %p1082_p6, %p2153_p1  ;;  %s1694_s18 = int_to_ptr.vmem [resolvable:$true] %s264_s18 }
  0x21   : > { %s2191_s4 = sld [smem:[#allocation32_spill]] }
  0x22   : > { %s2190_s19 = scalar_select %p1690_p7, 1, 0 }
  0x23   : > { %p1704_p9 = pneg %p1690_p7 }
  0x25   : > { %s2192_s15 = scalar_select %p1704_p9, 1, 0 }
  0x27   : > { %s1217_s22 = scalar_lea.hbm %s2191_s4, 16 }
  0x28   : > { %p1218_p8 = scmp.ne.s32.totalorder %s2191_s4, %s1217_s22  ;;  %p1224_p12 = scmp.lt.u32.totalorder %s1217_s22, %s2191_s4 }
  0x2a   : > { %p1220_p10 = pnand %p1704_p9, %p1218_p8 }
  0x2c   : > { %p1221_p11 = pneg %p1220_p10 }
  0x2e   : > { %p1226_p13 = pnand %p1224_p12, %p1221_p11 }
  0x30   : > { %1229 = shalt.err (!%p1226_p13)
}
  0x31   : > { %s1230_s20 = scalar_lea.vmem %s254_s16, 16  ;;  %s1237_s21 = scalar_lea.vmem %s254_s16, 32 }
  0x32   : > { %p1231_p0 = scmp.ne.s32.totalorder %s254_s16, %s1230_s20  ;;  %p1238_p6 = scmp.lt.s32.totalorder %s254_s16, %s254_s16 }
  0x33   : > { %p1239_p1 = scmp.lt.s32.totalorder %s1237_s21, %s1230_s20 }
  0x34   : > { %p1233_p2 = pnand %p1231_p0, %p1704_p9 }
  0x35   : > { %p1240_p4 = por %p1239_p1, %p1238_p6 }
  0x36   : > { %p1234_p3 = pneg %p1233_p2 }
  0x38   : > { %p1241_p5 = pnand %p1240_p4, %p1234_p3 }
  0x3a   : > { %1244 = shalt.err (!%p1241_p5)
}
  0x3b   : > { %1085 = dma.hbm_to_vmem [thread:$0]  (!%p1690_p7), %s2191_s4, 16, %s254_s16, [#allocation10]  }
  0x3c   : > { %s2193_s5 = sld [smem:[#allocation33_spill]] }
  0x42   : > { %s1245_s17 = scalar_lea.hbm %s2193_s5, 16 }
  0x43   : > { %p1246_p8 = scmp.ne.s32.totalorder %s2193_s5, %s1245_s17  ;;  %p1252_p4 = scmp.lt.u32.totalorder %s1245_s17, %s2193_s5 }
  0x45   : > { %p1248_p10 = pnand %p1246_p8, %p1704_p9 }
  0x47   : > { %p1249_p1 = pneg %p1248_p10 }
  0x49   : > { %p1254_p5 = pnand %p1252_p4, %p1249_p1 }
  0x4b   : > { %1257 = shalt.err (!%p1254_p5)
}
  0x4c   : > { %s1258_s16 = scalar_lea.vmem %s1694_s18, 16  ;;  %s1265_s30 = scalar_lea.vmem %s1694_s18, 32 }
  0x4d   : > { %p1259_p11 = scmp.ne.s32.totalorder %s1694_s18, %s1258_s16  ;;  %p1266_p0 = scmp.lt.s32.totalorder %s1694_s18, %s1694_s18 }
  0x4e   : > { %p1267_p2 = scmp.lt.s32.totalorder %s1265_s30, %s1258_s16 }
  0x4f   : > { %p1261_p12 = pnand %p1259_p11, %p1704_p9 }
  0x50   : > { %p1268_p3 = por %p1267_p2, %p1266_p0 }
  0x51   : > { %p1262_p13 = pneg %p1261_p12 }
  0x53   : > { %p1269_p6 = pnand %p1268_p3, %p1262_p13 }
  0x55   : > { %1272 = shalt.err (!%p1269_p6)
}
  0x56   : > { %1088 = dma.hbm_to_vmem [thread:$0]  (!%p1690_p7), %s2193_s5, 16, %s1694_s18, [#allocation13]  }
  0x57   : > { %p2159_p8 = scmp.eq.s32.totalorder %s1559_s11, 0  ;;  %p82_p10 = scmp.ne.s32.totalorder %s1527_s26, %s1523_s25 }
  0x58   : > { %p2157_p1 = scmp.lt.s32.totalorder %s1559_s11, 4  ;;  %s2158_s7 = sand.u32 1, %s1559_s11  }
  0x59   : > { %s2156_s22 = sand.u32 1, %s1527_s26   ;;  %p84_p4 = por %p82_p10, %p2159_p8 }
  0x5a   : > { %s1755_s17 = sshll.u32 %s2156_s22, 7  ;;  %s884_s20 = sshll.u32 %s1551_s9, 7 }
  0x5b   : > { %s2194_s1 = sld [smem:[#allocation30_spill]]  ;;  %s308_s18 = scalar_lea.vmem [#allocation6], %s1755_s17 }
  0x5c   : > { %s314_s8 = sshll.u32 %s308_s18, 4  ;;  %p1766_p5 = pnand %p2157_p1, %p84_p4  ;;  %s1770_s8 = int_to_ptr.vmem [resolvable:$true] %s314_s8 }
  0x5d   : > { %s1774_s22 = scalar_lea.sflag [#allocation7], %s2158_s7 }
  0x5e   : > { %s2195_s23 = scalar_select %p1766_p5, 1, 0 }
  0x5f   : > { %p1780_p12 = pneg %p1766_p5 }
  0x61   : > { %s1761_s30 = scalar_lea.hbm %s2194_s1, %s884_s20  ;;  %s1278_s24 = scalar_lea.hbm %s2194_s1, 4096 }
  0x62   : > { %s1273_s21 = scalar_lea.hbm %s1761_s30, 2048  ;;  %p1279_p2 = scmp.lt.u32.totalorder %s1761_s30, %s2194_s1 }
  0x63   : > { %p1274_p11 = scmp.ne.s32.totalorder %s1761_s30, %s1273_s21  ;;  %p1280_p3 = scmp.lt.u32.totalorder %s1278_s24, %s1273_s21 }
  0x64   : > { %p1282_p10 = scmp.lt.u32.totalorder %s1273_s21, %s1761_s30 }
  0x65   : > { %p1276_p13 = pnand %p1780_p12, %p1274_p11  ;;  %p1281_p6 = por %p1280_p3, %p1279_p2 }
  0x67   : > { %p1277_p0 = pneg %p1276_p13  ;;  %p1283_p4 = por %p1282_p10, %p1281_p6 }
  0x69   : > { %p1284_p1 = pnand %p1283_p4, %p1277_p0 }
  0x6b   : > { %1287 = shalt.err (!%p1284_p1)
}
  0x6c   : > { %s1288_s7 = scalar_lea.vmem %s1770_s8, 2048  ;;  %s1563_s16 = smov [#allocation6]  }
  0x6d   : > { %p1289_p11 = scmp.ne.s32.totalorder %s1770_s8, %s1288_s7  ;;  %s1293_s18 = sshll.u32 %s1563_s16, 4  ;;  %s1294_s18 = int_to_ptr.vmem [resolvable:$false] %s1293_s18 }
  0x6e   : > { %s1295_s4 = scalar_lea.vmem %s1294_s18, 4096  ;;  %p1296_p7 = scmp.lt.s32.totalorder %s1770_s8, %s1294_s18 }
  0x6f   : > { %p1291_p13 = pnand %p1289_p11, %p1780_p12  ;;  %p1297_p9 = scmp.lt.s32.totalorder %s1295_s4, %s1288_s7 }
  0x71   : > { %p1292_p8 = pneg %p1291_p13  ;;  %p1298_p2 = por %p1297_p9, %p1296_p7 }
  0x73   : > { %p1299_p3 = pnand %p1298_p2, %p1292_p8 }
  0x75   : > { %1302 = shalt.err (!%p1299_p3)
}
  0x76   : > { %s1564_s5 = smov 256   ;;  %s2170_s24 = smov 128  }
  0x77   : > { %s2171_s21 = smov 8   ;;  %s1567_s16 = smov [#allocation14]  }
  0x78   : > { %1098 = dma.hbm_to_vmem [thread:$0]  (!%p1766_p5), %s1761_s30, 2048, %s1770_s8, %s1774_s22, %s1564_s5, %s2170_s24, %s2171_s21  }
  0x79   : > { %s275_s1 = sshll.u32 %s1567_s16, 4  ;;  %s2197_s6 = sld [smem:[#allocation34_spill]]  ;;  %s276_s1 = int_to_ptr.vmem [resolvable:$true] %s275_s1 }
  0x7a   : > { %p2198_p9 = scmp.ne.s32.totalorder %s2192_s15, 0 }
  0x7f   : > { %s1303_s4 = scalar_lea.hbm %s2197_s6, 16 }
  0x80   : > { %p1304_p7 = scmp.ne.s32.totalorder %s2197_s6, %s1303_s4  ;;  %p1310_p0 = scmp.lt.u32.totalorder %s1303_s4, %s2197_s6 }
  0x82   : > { %p1306_p8 = pnand %p1304_p7, %p2198_p9 }
  0x84   : > { %p1307_p1 = pneg %p1306_p8 }
  0x86   : > { %p1312_p6 = pnand %p1310_p0, %p1307_p1 }
  0x88   : > { %1315 = shalt.err (!%p1312_p6)
}
  0x89   : > { %s1316_s30 = scalar_lea.vmem %s276_s1, 16  ;;  %s1323_s8 = scalar_lea.vmem %s276_s1, 32 }
  0x8a   : > { %p1317_p10 = scmp.ne.s32.totalorder %s276_s1, %s1316_s30  ;;  %p1324_p13 = scmp.lt.s32.totalorder %s276_s1, %s276_s1 }
  0x8b   : > { %p1325_p2 = scmp.lt.s32.totalorder %s1323_s8, %s1316_s30 }
  0x8c   : > { %p1319_p4 = pnand %p1317_p10, %p2198_p9 }
  0x8d   : > { %p1326_p3 = por %p1325_p2, %p1324_p13 }
  0x8e   : > { %p1320_p11 = pneg %p1319_p4 }
  0x90   : > { %p1327_p5 = pnand %p1326_p3, %p1320_p11 }
  0x92   : > { %1330 = shalt.err (!%p1327_p5)
}
  0x93   : > { %p2199_p7 = scmp.ne.s32.totalorder %s2190_s19, 0  ;;  %s875_s3 = sadd.s32 4294967294, %s1559_s11  }
  0x94   : > { %s39_s14 = sadd.s32 1, %s1551_s9  ;;  %s42_s19 = sadd.s32 1, %s1555_s10 }
  0x95   : > { %1091 = dma.hbm_to_vmem [thread:$0]  (!%p2199_p7), %s2197_s6, 16, %s276_s1, [#allocation13]  }
  0x96   : > { %p40_p5 = scmp.ge.s32.totalorder %s39_s14, 2  ;;  %s49_s15 = sadd.s32 1, %s1539_s29 }
  0x97   : > { %p56_p9 = scmp.ne.s32.totalorder %s1539_s29, %s1535_s28  ;;  %p2201_p8 = scmp.eq.s32.totalorder %s1559_s11, 0 }
  0x98   : > { %s2249_s14 = smov (%p40_p5, %s39_s14), 0  ;;  %s2251_s19 = smov (!%p40_p5, %s42_s19), %s1555_s10 }
  0x99   : > { %2200 = sst [smem:[#allocation27_spill]] %s2249_s14  ;;  %p1838_p1 = por %p2201_p8, %p56_p9 }
  0x9a   : > { %p62_p0 = scmp.ne.s32.totalorder %s1535_s28, %s1531_s27  ;;  %p44_p6 = scmp.ge.s32.totalorder %s2251_s19, 2 }
  0x9b   : > { %s72_s5 = ssub.s32 %s1551_s9, %s2249_s14  ;;  %p2203_p10 = scmp.eq.s32.totalorder %s1670_s12, 0 }
  0x9c   : > { %p73_p11 = scmp.eq.s32.totalorder %s72_s5, 0  ;;  %s2253_s19 = smov (%p44_p6, %s2251_s19), 0 }
  0x9d   : > { %p1851_p4 = por %p2203_p10, %p62_p0  ;;  %2205 = sst [smem:[#allocation28_spill]] %s2253_s19 }
  0x9e   : > { %s2206_s18 = sadd.s32 1, %s1527_s26  ;;  %s46_s4 = ssub.s32 %s1555_s10, %s2253_s19 }
  0x9f   : > { %s2204_s16 = scalar_select %p1851_p4, 1, 0 }
  0xa0   : > { %s1860_s7 = scalar_select %p73_p11, %s1527_s26, %s2206_s18  }
  0xa1   : > { %p227_p13 = scmp.eq.s32.totalorder %s1670_s12, 3  ;;  %p47_p2 = scmp.eq.s32.totalorder %s46_s4, 0 }
  0xa2   : > { %p233_p3 = scmp.eq.s32.totalorder %s875_s3, 3  ;;  %s286_s8 = sand.u32 1, %s1539_s29  }
  0xa3   : > { %p1868_p7 = por %p227_p13, %p56_p9  ;;  %s881_s5 = sshll.u32 %s286_s8, 3 }
  0xa4   : > { %s1874_s25 = scalar_select %p47_p2, %s1539_s29, %s49_s15  }
  0xa5   : > { %s2207_s30 = scalar_select %p1868_p7, 1, 0 }
  0xa6   : > { %p1879_p5 = por %p233_p3, %p62_p0  ;;  %s882_s18 = sshll.u32 %s1555_s10, 7 }
  0xa7   : > { %s2209_s0 = sld [smem:[#allocation29_spill]]  ;;  %s290_s3 = scalar_lea.vmem [#allocation3], %s881_s5 }
  0xa8   : > { %s2208_s13 = scalar_select %p1879_p5, 1, 0 }
  0xa9   : > { %s297_s6 = sshll.u32 %s290_s3, 4  ;;  %p2210_p9 = scmp.lt.s32.totalorder %s1559_s11, 4  ;;  %s1897_s6 = int_to_ptr.vmem [resolvable:$true] %s297_s6 }
  0xaa   : > { %s885_s19 = sshll.u32 %s1551_s9, 4  ;;  %s287_s24 = scalar_lea.sflag [#allocation4], %s286_s8 }
  0xab   : > { %p1893_p8 = pnand %p2210_p9, %p1838_p1 }
  0xad   : > { %s1887_s4 = scalar_lea.hbm %s2209_s0, %s882_s18  ;;  %p1333_p6 = pneg %p1893_p8 }
  0xae   : > { %s1331_s21 = scalar_lea.hbm %s1887_s4, 128  ;;  %s1336_s18 = scalar_lea.hbm %s2209_s0, 256 }
  0xaf   : > { %p1332_p0 = scmp.ne.s32.totalorder %s1887_s4, %s1331_s21  ;;  %p1337_p1 = scmp.lt.u32.totalorder %s1887_s4, %s2209_s0 }
  0xb0   : > { %p1338_p13 = scmp.lt.u32.totalorder %s1336_s18, %s1331_s21  ;;  %p1340_p3 = scmp.lt.u32.totalorder %s1331_s21, %s1887_s4 }
  0xb1   : > { %p1334_p10 = pnand %p1333_p6, %p1332_p0 }
  0xb2   : > { %p1339_p2 = por %p1338_p13, %p1337_p1 }
  0xb3   : > { %p1335_p11 = pneg %p1334_p10 }
  0xb4   : > { %p1341_p9 = por %p1340_p3, %p1339_p2 }
  0xb6   : > { %p1342_p5 = pnand %p1341_p9, %p1335_p11 }
  0xb8   : > { %1345 = shalt.err (!%p1342_p5)
}
  0xb9   : > { %s1346_s8 = scalar_lea.vmem %s1897_s6, 128  ;;  %s1568_s1 = smov [#allocation3]  }
  0xba   : > { %p1347_p0 = scmp.ne.s32.totalorder %s1897_s6, %s1346_s8  ;;  %s1351_s5 = sshll.u32 %s1568_s1, 4  ;;  %s1352_s5 = int_to_ptr.vmem [resolvable:$false] %s1351_s5 }
  0xbb   : > { %s1353_s14 = scalar_lea.vmem %s1352_s5, 256  ;;  %p1354_p4 = scmp.lt.s32.totalorder %s1897_s6, %s1352_s5 }
  0xbc   : > { %p1349_p10 = pnand %p1347_p0, %p1333_p6  ;;  %p1355_p1 = scmp.lt.s32.totalorder %s1353_s14, %s1346_s8 }
  0xbe   : > { %p1350_p7 = pneg %p1349_p10  ;;  %p1356_p13 = por %p1355_p1, %p1354_p4 }
  0xc0   : > { %p1357_p2 = pnand %p1356_p13, %p1350_p7 }
  0xc2   : > { %1360 = shalt.err (!%p1357_p2)
}
  0xc3   : > { %1095 = dma.hbm_to_vmem [thread:$0]  (!%p1893_p8), %s1887_s4, 128, %s1897_s6, %s287_s24  }
  0xc4   : > { %s1930_s3 = scalar_lea.hbm %s2146_s2, %s885_s19  ;;  %s2212_s1 = sand.u32 1, %s1527_s26  }
  0xc5   : > { %s327_s8 = scalar_lea.vmem [#allocation8], %s2212_s1  ;;  %s1361_s15 = scalar_lea.hbm %s1930_s3, 16 }
  0xc6   : > { %s334_s5 = sshll.u32 %s327_s8, 4  ;;  %p1362_p4 = scmp.ne.s32.totalorder %s1930_s3, %s1361_s15  ;;  %s335_s5 = int_to_ptr.vmem [resolvable:$true] %s334_s5 }
  0xc7   : > { %s1366_s24 = scalar_lea.hbm %s2146_s2, 32  ;;  %p1367_p8 = scmp.lt.u32.totalorder %s1930_s3, %s2146_s2 }
  0xc8   : > { %p1364_p7 = pnand %p1362_p4, %p1780_p12  ;;  %p1368_p6 = scmp.lt.u32.totalorder %s1366_s24, %s1361_s15 }
  0xc9   : > { %p1370_p3 = scmp.lt.u32.totalorder %s1361_s15, %s1930_s3 }
  0xca   : > { %p1365_p5 = pneg %p1364_p7  ;;  %p1369_p11 = por %p1368_p6, %p1367_p8 }
  0xcc   : > { %p1371_p9 = por %p1370_p3, %p1369_p11 }
  0xce   : > { %p1372_p0 = pnand %p1371_p9, %p1365_p5 }
  0xd0   : > { %1375 = shalt.err (!%p1372_p0)
}
  0xd1   : > { %s1376_s21 = scalar_lea.vmem %s335_s5, 16  ;;  %s1569_s18 = smov [#allocation8]  }
  0xd2   : > { %p1377_p10 = scmp.ne.s32.totalorder %s335_s5, %s1376_s21  ;;  %s1381_s1 = sshll.u32 %s1569_s18, 4  ;;  %s1382_s1 = int_to_ptr.vmem [resolvable:$false] %s1381_s1 }
  0xd3   : > { %s1383_s8 = scalar_lea.vmem %s1382_s1, 32  ;;  %p1384_p2 = scmp.lt.s32.totalorder %s335_s5, %s1382_s1 }
  0xd4   : > { %p1379_p1 = pnand %p1377_p10, %p1780_p12  ;;  %p1385_p4 = scmp.lt.s32.totalorder %s1383_s8, %s1376_s21 }
  0xd6   : > { %p1380_p13 = pneg %p1379_p1  ;;  %p1386_p7 = por %p1385_p4, %p1384_p2 }
  0xd8   : > { %p1387_p6 = pnand %p1386_p7, %p1380_p13 }
  0xda   : > { %1390 = shalt.err (!%p1387_p6)
}
  0xdb   : > { %p2213_p8 = scmp.ne.s32.totalorder %s2195_s23, 0  ;;  %s907_s15 = sshll.u32 %s1551_s9, 11 }
  0xdc   : > { %s2214_s24 = sld [smem:[#allocation31_spill]]  ;;  %s345_s21 = scalar_lea.vmem [#allocation9], %s1755_s17 }
  0xdd   : > { %1101 = dma.hbm_to_vmem [thread:$0]  (!%p2213_p8), %s1930_s3, 16, %s335_s5, %s1774_s22  }
  0xde   : > { %s352_s18 = sshll.u32 %s345_s21, 4  ;;  %s2216_s1 = sand.u32 1, %s1559_s11   ;;  %s1959_s18 = int_to_ptr.vmem [resolvable:$true] %s352_s18 }
  0xdf   : > { %s1963_s8 = scalar_lea.sflag [#allocation10], %s2216_s1 }
  0xe2   : > { %s2215_s14 = smov %s2214_s24  ;;  %s1956_s19 = scalar_lea.hbm %s2214_s24, %s907_s15 }
  0xe3   : > { %s1391_s0 = scalar_lea.hbm %s1956_s19, 2048  ;;  %s1396_s5 = scalar_lea.hbm %s2215_s14, 4096 }
  0xe4   : > { %p1392_p5 = scmp.ne.s32.totalorder %s1956_s19, %s1391_s0  ;;  %p1397_p9 = scmp.lt.u32.totalorder %s1956_s19, %s2215_s14 }
  0xe5   : > { %p1398_p0 = scmp.lt.u32.totalorder %s1396_s5, %s1391_s0  ;;  %p1400_p1 = scmp.lt.u32.totalorder %s1391_s0, %s1956_s19 }
  0xe6   : > { %p1394_p11 = pnand %p1392_p5, %p1780_p12 }
  0xe7   : > { %p1399_p10 = por %p1398_p0, %p1397_p9 }
  0xe8   : > { %p1395_p3 = pneg %p1394_p11 }
  0xe9   : > { %p1401_p13 = por %p1400_p1, %p1399_p10 }
  0xeb   : > { %p1402_p2 = pnand %p1401_p13, %p1395_p3 }
  0xed   : > { %1405 = shalt.err (!%p1402_p2)
}
  0xee   : > { %s1406_s17 = scalar_lea.vmem %s1959_s18, 2048  ;;  %s1570_s4 = smov [#allocation9]  }
  0xef   : > { %p1407_p4 = scmp.ne.s32.totalorder %s1959_s18, %s1406_s17  ;;  %s1411_s24 = sshll.u32 %s1570_s4, 4  ;;  %s1412_s24 = int_to_ptr.vmem [resolvable:$false] %s1411_s24 }
  0xf0   : > { %s1413_s21 = scalar_lea.vmem %s1412_s24, 4096  ;;  %p1414_p5 = scmp.lt.s32.totalorder %s1959_s18, %s1412_s24 }
  0xf1   : > { %p1409_p7 = pnand %p1407_p4, %p1780_p12  ;;  %p1415_p11 = scmp.lt.s32.totalorder %s1413_s21, %s1406_s17 }
  0xf3   : > { %p1410_p6 = pneg %p1409_p7  ;;  %p1416_p9 = por %p1415_p11, %p1414_p5 }
  0xf5   : > { %p1417_p0 = pnand %p1416_p9, %p1410_p6 }
  0xf7   : > { %1420 = shalt.err (!%p1417_p0)
}
  0xf8   : > { %s2217_s0 = smov 8   ;;  %s2218_s1 = smov 128  }
  0xf9   : > { %1104 = dma.hbm_to_vmem [thread:$0]  (!%p2213_p8), %s1956_s19, 2048, %s1959_s18, %s1963_s8, %s2218_s1, %s2218_s1, %s2217_s0  }
  0xfa   : > { %s2219_s20 = sld [smem:[#allocation26_spill]] }
 0x100   : > { %p2220_p12 = scmp.ne.s32.totalorder %s2219_s20, 0 }
 0x101   : > { %s1993_s22 = sand.u32 (!%p2220_p12), 1, %s1535_s28   ;;  %p2221_p3 = scmp.ne.s32.totalorder (!%p2220_p12), %s2204_s16, 0 }
 0x102   : > { %364 = sbr.rel (%p2220_p12) target bundleno = 976 (0x3d0), region = 48  ;;  %s890_s3 = sshll.u32 (!%p2220_p12), %s1993_s22, 3 }
 0x103   : > { %s367_s5 = scalar_lea.sflag (!%p2220_p12), [#allocation4], %s1993_s22  ;;  %s1997_s15 = scalar_lea.vmem (!%p2220_p12), [#allocation3], %s890_s3 }
 0x109   : > { %1494 = dma.done.wait (%p2221_p3), %s367_s5, 128  }
 0x10a   : > { %1496 = vsyncadd (%p2221_p3), %s367_s5, 4294967168  ;;  %s2222_s23 = sld [smem:[#allocation22_spill]]  ;;  %s2223_s19 = sld [smem:[#allocation25_spill]] }
 0x10b   : > { %s375_s18 = sand.u32 1, %s1670_s12  }
 0x10c   : > { %s376_s17 = scalar_lea.sflag [#allocation7], %s375_s18 }
 0x110   : > { %s377_s8 = sand.u32 1, %s2222_s23   ;;  %p2224_p8 = scmp.ne.s32.totalorder %s2223_s19, 0 }
 0x111   : > { %s891_s6 = sshll.u32 %s377_s8, 7 }
 0x112   : > { %s2005_s4 = scalar_lea.vmem [#allocation6], %s891_s6 }
 0x113   : > { %1498 = dma.done.wait (%p2224_p8), %s376_s17, 2064  }
 0x114   : > { %1500 = vsyncadd (%p2224_p8), %s376_s17, 4294965232  ;;  %s2011_s24 = scalar_lea.vmem [#allocation8], %s377_s8  ;;  %s393_s21 = scalar_lea.sflag [#allocation10], %s375_s18 }
 0x115   : > { %s2013_s16 = scalar_lea.vmem [#allocation9], %s891_s6 }
 0x116   : > { %1502 = dma.done.wait (%p2224_p8), %s393_s21, 2048  }
 0x117   : > { %1504 = vsyncadd (%p2224_p8), %s393_s21, 4294965248  ;;  %p2225_p10 = scmp.eq.s32.totalorder %s1670_s12, 0 }
 0x119   : > { %1506 = dma.done.wait (%p2225_p10), [#allocation10], 16   ;;  %p2226_p1 = pmov %p2225_p10 }
 0x11b   : > { %1508 = vsyncadd (%p2226_p1), [#allocation10], 4294967280  ;;  %p2227_p13 = pmov %p2226_p1 }
 0x11c   : > { %p2228_p2 = pmov %p2226_p1 }
 0x11d   : > { %1510 = dma.done.wait (%p2227_p13), [#allocation13], 32  }
 0x11e   : > { %1512 = vsyncadd (%p2228_p2), [#allocation13], 4294967264  ;;  %s2027_s0 = scalar_lea.vmem [#allocation15], %s890_s3  ;;  %s2229_s1 = sld [smem:[#allocation23_spill]] }
 0x124   : > { %p897_p4 = scmp.ne.s32.totalorder %s2229_s1, 0 }
 0x125   : > { %v1571_v0 = vmov (!%p897_p4), 0.0  }
 0x126   : > { %457 = sbr.rel (%p897_p4) target bundleno = 301 (0x12d), region = 80  ;;  %458 = vst [vmem:[#allocation2] sm:$0xff] (!%p897_p4), %v1571_v0 }
 0x12d PF: > { %v460_v1 = vld [vmem:[%s2005_s4] sm:$0xff]  ;;  %v461_v2 = vld [vmem:[%s2005_s4 + $0x8] sm:$0xff]  ;;  %v462_v3 = vld [vmem:[%s2005_s4 + $0x10] sm:$0xff]  ;;  %v1572_v4 = vmov 0.0|0.0   ;;  %vm1573_vm0 = vmmov 0   ;;  %v1574_v7 = vmov 0.0  }
 0x12e   : > { %1012 = vmatprep.subr.bf16.mxu0 %v1572_v4  ;;  %v1013_v5 = vpack.c.bf16 %v461_v2, %v460_v1  ;;  %v463_v6 = vld [vmem:[%s2005_s4 + $0x18] sm:$0xff]  ;;  %974 = vmatprep.mubr.msk.f32.mxu0 %vm1573_vm0, %v1574_v7  ;;  %v464_v9 = vld [vmem:[%s2005_s4 + $0x20] sm:$0xff]  ;;  %v465_v10 = vld [vmem:[%s2005_s4 + $0x28] sm:$0xff]  ;;  %s2230_s12 = sld [smem:[#allocation23_spill]] }
 0x12f   : > { %1036 = vmatprep.subr.bf16.mxu1 %v1572_v4  ;;  %1009 = vmatprep.mubr.msk.f32.mxu1 %vm1573_vm0, %v1574_v7  ;;  %v1016_v8 = vpack.c.bf16 %v463_v6, %v462_v3  ;;  %v555_v11 = vld [vmem:[%s2013_s16] sm:$0xff]  ;;  %v556_v12 = vld [vmem:[%s2013_s16 + $0x8] sm:$0xff]  ;;  %v557_v13 = vld [vmem:[%s2013_s16 + $0x10] sm:$0xff]  ;;  %v1019_v15 = vpack.c.bf16 %v465_v10, %v464_v9 }
 0x130   : > { %1014 = vmatpush3.bf16.msra.mxu0 %v1013_v5  ;;  %v558_v14 = vld [vmem:[%s2013_s16 + $0x18] sm:$0xff]  ;;  %v1037_v16 = vpack.c.bf16 %v556_v12, %v555_v11  ;;  %v466_v17 = vld [vmem:[%s2005_s4 + $0x30] sm:$0xff]  ;;  %v559_v20 = vld [vmem:[%s2013_s16 + $0x20] sm:$0xff] }
 0x131   : > { %1015 = vmatprep.subr.bf16.mxu0 %v1572_v4  ;;  %v467_v18 = vld [vmem:[%s2005_s4 + $0x38] sm:$0xff]  ;;  %v1040_v19 = vpack.c.bf16 %v558_v14, %v557_v13  ;;  %v560_v21 = vld [vmem:[%s2013_s16 + $0x28] sm:$0xff]  ;;  %v468_v23 = vld [vmem:[%s2005_s4 + $0x40] sm:$0xff] }
 0x132   : > { %1038 = vmatpush3.bf16.msra.mxu1 %v1037_v16  ;;  %v1022_v22 = vpack.c.bf16 %v467_v18, %v466_v17  ;;  %v469_v24 = vld [vmem:[%s2005_s4 + $0x48] sm:$0xff]  ;;  %v1043_v25 = vpack.c.bf16 %v560_v21, %v559_v20  ;;  %v561_v26 = vld [vmem:[%s2013_s16 + $0x30] sm:$0xff]  ;;  %v562_v27 = vld [vmem:[%s2013_s16 + $0x38] sm:$0xff] }
 0x133   : > { %1039 = vmatprep.subr.bf16.mxu1 %v1572_v4  ;;  %v1025_v28 = vpack.c.bf16 %v469_v24, %v468_v23  ;;  %v470_v29 = vld [vmem:[%s2005_s4 + $0x50] sm:$0xff]  ;;  %v471_v30 = vld [vmem:[%s2005_s4 + $0x58] sm:$0xff]  ;;  %v1046_v31 = vpack.c.bf16 %v562_v27, %v561_v26  ;;  %v563_v32 = vld [vmem:[%s2013_s16 + $0x40] sm:$0xff] }
 0x134   : > { %1017 = vmatpush3.bf16.msra.mxu0 %v1016_v8  ;;  %v564_v33 = vld [vmem:[%s2013_s16 + $0x48] sm:$0xff]  ;;  %v1028_v34 = vpack.c.bf16 %v471_v30, %v470_v29  ;;  %v472_v35 = vld [vmem:[%s2005_s4 + $0x60] sm:$0xff]  ;;  %v565_v38 = vld [vmem:[%s2013_s16 + $0x50] sm:$0xff]  ;;  %p899_p7 = scmp.ne.s32.totalorder %s2230_s12, 1 }
 0x135   : > { %1018 = vmatprep.subr.bf16.mxu0 %v1572_v4  ;;  %v473_v36 = vld [vmem:[%s2005_s4 + $0x68] sm:$0xff]  ;;  %v1049_v37 = vpack.c.bf16 %v564_v33, %v563_v32  ;;  %v566_v39 = vld [vmem:[%s2013_s16 + $0x58] sm:$0xff]  ;;  %v474_v41 = vld [vmem:[%s2005_s4 + $0x70] sm:$0xff] }
 0x136   : > { %1041 = vmatpush3.bf16.msra.mxu1 %v1040_v19  ;;  %v1031_v40 = vpack.c.bf16 %v473_v36, %v472_v35  ;;  %v475_v42 = vld [vmem:[%s2005_s4 + $0x78] sm:$0xff]  ;;  %v1052_v43 = vpack.c.bf16 %v566_v39, %v565_v38  ;;  %v567_v44 = vld [vmem:[%s2013_s16 + $0x60] sm:$0xff]  ;;  %v568_v45 = vld [vmem:[%s2013_s16 + $0x68] sm:$0xff] }
 0x137   : > { %1042 = vmatprep.subr.bf16.mxu1 %v1572_v4  ;;  %v1034_v46 = vpack.c.bf16 %v475_v42, %v474_v41  ;;  %v1055_v47 = vpack.c.bf16 %v568_v45, %v567_v44  ;;  %v459_v48 = vld [vmem:[%s1997_s15] sm:$0xff]  ;;  %v898_v52 = vld [vmem:[%s2011_s24] ss:$0 sm:$0xff]  ;;  %v900_v62 = vld [vmem:[#allocation11] ss:$0 sm:$0xff] (!%p899_p7) }
 0x138   : > { %1020 = vmatpush3.bf16.msra.mxu0 %v1019_v15  ;;  %v569_v49 = vld [vmem:[%s2013_s16 + $0x70] sm:$0xff]  ;;  %v570_v50 = vld [vmem:[%s2013_s16 + $0x78] sm:$0xff]  ;;  %v554_v57 = vld [vmem:[#allocation2] sm:$0xff] }
 0x139   : > { %1021 = vmatprep.subr.bf16.mxu0 %v1572_v4  ;;  %v1058_v51 = vpack.c.bf16 %v570_v50, %v569_v49  ;;  %v901_v12 = vld [vmem:[#allocation12] ss:$0 sm:$0xff] (!%p899_p7)  ;;  %v902_v14 = vld [vmem:[#allocation14] ss:$0 sm:$0xff] (!%p899_p7) }
 0x13a   : > { %1044 = vmatpush3.bf16.msra.mxu1 %v1043_v25 }
 0x13b   : > { %1045 = vmatprep.subr.bf16.mxu1 %v1572_v4 }
 0x13c   : > { %1023 = vmatpush3.bf16.msra.mxu0 %v1022_v22 }
 0x13d   : > { %1024 = vmatprep.subr.bf16.mxu0 %v1572_v4 }
 0x13e   : > { %1047 = vmatpush3.bf16.msra.mxu1 %v1046_v31 }
 0x13f   : > { %1048 = vmatprep.subr.bf16.mxu1 %v1572_v4 }
 0x140   : > { %1026 = vmatpush3.bf16.msra.mxu0 %v1025_v28 }
 0x141   : > { %1027 = vmatprep.subr.bf16.mxu0 %v1572_v4 }
 0x142   : > { %1050 = vmatpush3.bf16.msra.mxu1 %v1049_v37 }
 0x143   : > { %1051 = vmatprep.subr.bf16.mxu1 %v1572_v4 }
 0x144   : > { %1029 = vmatpush3.bf16.msra.mxu0 %v1028_v34 }
 0x145   : > { %1030 = vmatprep.subr.bf16.mxu0 %v1572_v4 }
 0x146   : > { %1053 = vmatpush3.bf16.msra.mxu1 %v1052_v43 }
 0x147   : > { %1054 = vmatprep.subr.bf16.mxu1 %v1572_v4 }
 0x148   : > { %1032 = vmatpush3.bf16.msra.mxu0 %v1031_v40 }
 0x149   : > { %1033 = vmatprep.subr.bf16.mxu0 %v1572_v4 }
 0x14a   : > { %1056 = vmatpush3.bf16.msra.mxu1 %v1055_v47 }
 0x14b   : > { %1057 = vmatprep.subr.bf16.mxu1 %v1572_v4 }
 0x14c   : > { %1035 = vmatpush3.bf16.msra.mxu0 %v1034_v46 }
 0x14e   : > { %1059 = vmatpush3.bf16.msra.mxu1 %v1058_v51 }
 0x14f   : > { %975 = vmatmul.mubr.f32.vlgmr.msra.gmra.mrb[0].mxu0 %v459_v48 }
 0x222   : > { %v549_v53 = vpop.f32.mrb[0].mxu0 }
 0x223   : > { %v550_v54 = vadd.f32 %v898_v52, %v549_v53  ;;  %v976_v55 = vpop.f32.mrb[1].mxu0 }
 0x225   : > { %v553_v56 = vmax.f32 %v550_v54, 0.0 }
 0x227   : > { %1010 = vmatmul.mubr.f32.vlgmr.msra.gmra.mrb[0].mxu1 %v553_v56 }
 0x2f7   : > { %646 = sbr.rel (%p899_p7) target bundleno = 949 (0x3b5), region = 84 }
 0x2fa   : > { %v637_v58 = vpop.f32.mrb[0].mxu1 }
 0x2fb   : > { %v641_v59 = vadd.f32 %v637_v58, %v554_v57  ;;  %v1011_v60 = vpop.f32.mrb[1].mxu1 }
 0x2fd   : > { %642 = vst [vmem:[#allocation2] sm:$0xff] %v641_v59 }
 0x304   : > { %v647_v61 = vld [vmem:[#allocation2] sm:$0xff] }
 0x305   : > { %v648_v63 = vadd.f32 %v647_v61, %v459_v48 }
 0x307   : > { %v656_v0 = vadd.f32 %v900_v62, %v648_v63 }
 0x309   : > { %657 = vadd.xlane.f32.xlu0 %v656_v0  ;;  %v659_v1 = vmul.f32 %v656_v0, %v656_v0 }
 0x30d   : > { %660 = vadd.xlane.f32.xlu0 %v659_v1 }
 0x396   : > { %v658_v2 = vpop.xlane.xlu0 %657 }
 0x397   : > { %v662_v3 = vmul.f32 0.03125, %v658_v2 }
 0x399   : > { %v664_v5 = vmul.f32 %v662_v3, %v662_v3  ;;  %v667_v10 = vsub.f32 %v656_v0, %v662_v3 }
 0x39a   : > { %v661_v4 = vpop.xlane.xlu0 %660 }
 0x39b   : > { %v663_v6 = vmul.f32 0.03125, %v661_v4 }
 0x39d   : > { %v665_v7 = vsub.f32 %v663_v6, %v664_v5 }
 0x39f   : > { %v666_v8 = vmax.f32 %v665_v7, 0.0 }
 0x3a1   : > { %v668_v9 = vadd.f32 1e-05, %v666_v8 }
 0x3a3   : > { %1215 = vrsqrt.f32 %v668_v9 }
 0x3ad   : > { %v1216_v11 = vpop.eup %1215 }
 0x3ae   : > { %v670_v13 = vmul.f32 %v1216_v11, %v667_v10 }
 0x3b0   : > { %v678_v15 = vmul.f32 %v901_v12, %v670_v13 }
 0x3b2   : > { %v686_v16 = vadd.f32 %v902_v14, %v678_v15 }
 0x3b4   : > { %687 = vst [vmem:[%s2027_s0] sm:$0xff] %v686_v16 }
 0x3b5 PF: > { %s2231_s20 = sld [smem:[#allocation24_spill]]  ;;  %s2232_s23 = sld [smem:[#allocation35_spill]] }
 0x3b6   : > { %s702_s18 = sshll.u32 %s2027_s0, 4  ;;  %s689_s8 = scalar_lea.sflag [#allocation5], %s1993_s22  ;;  %s703_s18 = int_to_ptr.vmem [resolvable:$true] %s702_s18 }
 0x3b7   : > { %s1421_s6 = scalar_lea.vmem %s703_s18, 128  ;;  %p2233_p5 = scmp.ne.s32.totalorder %s2207_s30, 0 }
 0x3b8   : > { %p1422_p6 = scmp.ne.s32.totalorder %s703_s18, %s1421_s6  ;;  %s1575_s17 = smov [#allocation15]  }
 0x3b9   : > { %s1425_s4 = sshll.u32 %s1575_s17, 4  ;;  %s1426_s4 = int_to_ptr.vmem [resolvable:$false] %s1425_s4 }
 0x3ba   : > { %p1423_p11 = pnand %p1422_p6, %p2233_p5  ;;  %s1427_s24 = scalar_lea.vmem %s1426_s4, 256 }
 0x3bb   : > { %s904_s3 = sshll.u32 %s2231_s20, 7  ;;  %p1428_p0 = scmp.lt.s32.totalorder %s703_s18, %s1426_s4 }
 0x3bc   : > { %s2086_s19 = scalar_lea.hbm %s2232_s23, %s904_s3  ;;  %p1424_p9 = pneg %p1423_p11 }
 0x3bd   : > { %p1429_p12 = scmp.lt.s32.totalorder %s1427_s24, %s1421_s6 }
 0x3bf   : > { %p1430_p3 = por %p1429_p12, %p1428_p0 }
 0x3c1   : > { %p1431_p8 = pnand %p1430_p3, %p1424_p9 }
 0x3c3   : > { %1434 = shalt.err (!%p1431_p8)
}
 0x3c4   : > { %s1435_s22 = scalar_lea.hbm %s2086_s19, 128  ;;  %s1439_s0 = scalar_lea.hbm %s2232_s23, 256 }
 0x3c5   : > { %p1436_p10 = scmp.ne.s32.totalorder %s2086_s19, %s1435_s22  ;;  %p1440_p2 = scmp.lt.u32.totalorder %s2086_s19, %s2232_s23 }
 0x3c6   : > { %p1441_p4 = scmp.lt.u32.totalorder %s1439_s0, %s1435_s22  ;;  %p1443_p6 = scmp.lt.u32.totalorder %s1435_s22, %s2086_s19 }
 0x3c7   : > { %p1437_p1 = pnand %p1436_p10, %p2233_p5 }
 0x3c8   : > { %p1442_p7 = por %p1441_p4, %p1440_p2 }
 0x3c9   : > { %p1438_p13 = pneg %p1437_p1 }
 0x3ca   : > { %p1444_p11 = por %p1443_p6, %p1442_p7 }
 0x3cc   : > { %p1445_p9 = pnand %p1444_p11, %p1438_p13 }
 0x3ce   : > { %1448 = shalt.err (!%p1445_p9)
}
 0x3cf   : > { %1080 = dma.vmem_to_hbm [thread:$0]  (%p2233_p5), %s703_s18, 128, %s2086_s19, %s689_s8  }
 0x3d0 PF: > { %p1116_p0 = scmp.ge.s32.totalorder %s1559_s11, 2  ;;  %s714_s20 = sand.u32 1, %s1531_s27  }
 0x3d1   : > { %p2234_p12 = scmp.ne.s32.totalorder %s2208_s13, 0  ;;  %s715_s3 = scalar_lea.sflag [#allocation5], %s714_s20 }
 0x3d3   : > { %p1106_p3 = pnand %p1116_p0, %p2234_p12 }
 0x3d5   : > { %1514 = dma.done.wait (!%p1106_p3), %s715_s3, 128  }
 0x3d6   : > { %1516 = vsyncadd (!%p1106_p3), %s715_s3, 4294967168  ;;  %s30_s11 = sadd.s32 1, %s1559_s11   ;;  %s2235_s24 = sld [smem:[#allocation22_spill]] }
 0x3d7   : > { %p27_p8 = scmp.ge.s32.totalorder %s30_s11, 6   ;;  %s2236_s30 = smov %s1874_s25 }
 0x3d8   : > { %s2237_s5 = sld [smem:[#allocation27_spill]]  ;;  %s2238_s15 = sld [smem:[#allocation28_spill]] }
 0x3d9   : > { %s2239_s25 = smov %s1527_s26  ;;  %s2240_s26 = smov %s1860_s7 }
 0x3da   : > { %s2241_s27 = smov %s1535_s28  ;;  %s2242_s28 = smov %s1539_s29 }
 0x3db   : > { %s2243_s29 = smov %s2236_s30  ;;  %s2244_s30 = smov %s1551_s9 }
 0x3dc   : > { %s2245_s8 = smov %s1555_s10  ;;  %29 = sbr.rel (!%p27_p8) target bundleno = 22 (0x16), region = 150 }
 0x3de   : > { %s2246_s9 = smov %s2237_s5  ;;  %s2247_s10 = smov %s2238_s15 }
 0x3e3   :  { %720 = vsyncpa [#allocation4], 1 }
 0x3e4   :  { %722 = vsyncpa [#allocation4 + $0x1], 1 }
 0x3e5   :  { %723 = vsyncpa [#allocation7], 1 }
 0x3e6   :  { %725 = vsyncpa [#allocation7 + $0x1], 1 }
 0x3e7   :  { %726 = vsyncpa [#allocation10], 1 }
 0x3e8   :  { %728 = vsyncpa [#allocation10 + $0x1], 1 }
 0x3e9   :  { %729 = vsyncpa [#allocation13], 1 }
 0x3ea   :  { %730 = vsyncpa [#allocation5], 1 }
 0x3eb   :  { %732 = vsyncpa [#allocation5 + $0x1], 1 }

</bundles_post_ra>
